<compile_context>
chip_gen: v7x
topology: tpu7x:2x2x1
jax: 0.10.0
libtpu: 0.0.40
codegen_flags: <defaults>
</compile_context>

<pallas_src>
import jax
import jax.numpy as jnp
from jax import lax
from jax.experimental import pallas as pl
from jax.experimental.pallas import tpu as pltpu
import numpy as np


def demo_encoder_kernel(x_ref, wih_ref, whh_ref, b_ref,
                        w1_ref, b1_ref, w2_ref, b2_ref,
                        out_ref, hlast_ref):
    """Single-invocation LSTM encoder + batched 2-layer head.

    x_ref:     (T, B, D)  demo sequence (seq-major, PyTorch default LSTM layout)
    wih_ref:   (D, 4H)    W_ih^T
    whh_ref:   (H, 4H)    W_hh^T
    b_ref:     (1, 4H)    b_ih + b_hh
    w1_ref:    (H, H)     linear1 weight^T
    b1_ref:    (1, H)
    w2_ref:    (H, G)     output layer weight^T
    b2_ref:    (1, G)
    out_ref:   (T, G)
    hlast_ref: (T, H)     VMEM scratch collecting h_t[B-1] for every timestep
    """
    T, B, _ = x_ref.shape
    H = whh_ref.shape[0]

    # Weights stay resident for the whole (tiny) recurrence.
    wih = wih_ref[...]          # (D, 4H)
    whh = whh_ref[...]          # (H, 4H)
    b = b_ref[...]              # (1, 4H)

    h = jnp.zeros((B, H), jnp.float32)
    c = jnp.zeros((B, H), jnp.float32)

    # T is small and static -> fully unrolled recurrence inside one invocation.
    for t in range(T):
        x_t = x_ref[t]                                        # (B, D)
        gates = (jnp.dot(x_t, wih, preferred_element_type=jnp.float32)
                 + jnp.dot(h, whh, preferred_element_type=jnp.float32)
                 + b)                                         # (B, 4H)

        # Full-width transcendentals (one sigmoid + one tanh over all 4H lanes),
        # then cheap lane slices per gate. PyTorch gate order: [i, f, g, o].
        sig = jax.nn.sigmoid(gates)
        th = jnp.tanh(gates)
        i_g = sig[:, 0 * H:1 * H]
        f_g = sig[:, 1 * H:2 * H]
        g_g = th[:, 2 * H:3 * H]
        o_g = sig[:, 3 * H:4 * H]

        c = f_g * c + i_g * g_g
        h = o_g * jnp.tanh(c)

        # Stash h_t of the LAST batch element; head is applied after the loop.
        hlast_ref[pl.ds(t, 1), :] = h[B - 1:B, :]             # static t -> static store

    # Batched MLP head over all timesteps at once.
    hl = hlast_ref[...]                                                       # (T, H)
    z = jnp.maximum(
        jnp.dot(hl, w1_ref[...], preferred_element_type=jnp.float32) + b1_ref[...],
        0.0)                                                                  # (T, H)
    out_ref[...] = (jnp.dot(z, w2_ref[...], preferred_element_type=jnp.float32)
                    + b2_ref[...])                                            # (T, G)


def demo_encoder_forward(demos, params):
    """demos: (T, B, D) float32. Returns (T, G) float32."""
    w_ih, w_hh, b_ih, b_hh, w1, b1, w2, b2 = params
    T, B, D = demos.shape
    H = w_hh.shape[1]
    G = w2.shape[0]

    # Pre-transpose / fold biases (plain-JAX glue outside the kernel).
    wih_t = w_ih.T                              # (D, 4H)
    whh_t = w_hh.T                              # (H, 4H)
    b_all = (b_ih + b_hh).reshape(1, 4 * H)     # (1, 4H)
    w1_t = w1.T                                 # (H, H)
    b1_r = b1.reshape(1, H)
    w2_t = w2.T                                 # (H, G)
    b2_r = b2.reshape(1, G)

    vmem = pl.BlockSpec(memory_space=pltpu.MemorySpace.VMEM)

    return pl.pallas_call(
        demo_encoder_kernel,
        out_shape=jax.ShapeDtypeStruct((T, G), jnp.float32),
        in_specs=[vmem] * 8,
        out_specs=vmem,
        scratch_shapes=[pltpu.VMEM((T, H), jnp.float32)],   # h_t[B-1] rows
    )(demos, wih_t, whh_t, b_all, w1_t, b1_r, w2_t, b2_r)


def reference_forward(demos, params):
    """Pure-JAX reference matching PyTorch nn.LSTM + head semantics."""
    w_ih, w_hh, b_ih, b_hh, w1, b1, w2, b2 = params
    T, B, D = demos.shape
    H = w_hh.shape[1]

    def step(carry, x_t):
        h, c = carry
        gates = x_t @ w_ih.T + b_ih + h @ w_hh.T + b_hh
        i_g = jax.nn.sigmoid(gates[:, 0 * H:1 * H])
        f_g = jax.nn.sigmoid(gates[:, 1 * H:2 * H])
        g_g = jnp.tanh(gates[:, 2 * H:3 * H])
        o_g = jax.nn.sigmoid(gates[:, 3 * H:4 * H])
        c_new = f_g * c + i_g * g_g
        h_new = o_g * jnp.tanh(c_new)
        return (h_new, c_new), h_new

    h0 = jnp.zeros((B, H), jnp.float32)
    c0 = jnp.zeros((B, H), jnp.float32)
    _, lstm_out = lax.scan(step, (h0, c0), demos)      # (T, B, H)
    x = jnp.maximum(lstm_out[:, -1] @ w1.T + b1, 0.0)  # (T, H)
    return x @ w2.T + b2                               # (T, G)


def init_params(key, input_dim, hidden_dim, goal_distrib_dim):
    """Deterministic init mimicking PyTorch uniform(-1/sqrt(H), 1/sqrt(H))."""
    ks = jax.random.split(key, 8)
    s = 1.0 / jnp.sqrt(hidden_dim)
    u = lambda k, shape: jax.random.uniform(k, shape, jnp.float32, -s, s)
    w_ih = u(ks[0], (4 * hidden_dim, input_dim))
    w_hh = u(ks[1], (4 * hidden_dim, hidden_dim))
    b_ih = u(ks[2], (4 * hidden_dim,))
    b_hh = u(ks[3], (4 * hidden_dim,))
    w1 = u(ks[4], (hidden_dim, hidden_dim))
    b1 = u(ks[5], (hidden_dim,))
    w2 = u(ks[6], (goal_distrib_dim, hidden_dim))
    b2 = u(ks[7], (goal_distrib_dim,))
    return (w_ih, w_hh, b_ih, b_hh, w1, b1, w2, b2)


if __name__ == "__main__":
    # env_params: obs=10, action=6 -> input_dim=16; max_demo_size=8
    T, B, D = 8, 3, 16          # (seq_len, batch, obs+action)
    H, G = 32, 8                # hidden_dim, goal_distrib_dim

    key = jax.random.PRNGKey(0)
    k_demo, k_par = jax.random.split(key)
    demos = jax.random.normal(k_demo, (T, B, D), jnp.float32)
    params = init_params(k_par, D, H, G)

    out = demo_encoder_forward(demos, params)
    out = jax.block_until_ready(out)

    ref = reference_forward(demos, params)
    np.testing.assert_allclose(np.asarray(out), np.asarray(ref), rtol=1e-5, atol=1e-5)

    print("KERNEL_OK")
</pallas_src>

<mosaic_0001>
module attributes {stable_mosaic.version = 11 : i64} {
  func.func @demo_encoder_kernel(%arg0: memref<8x3x16xf32, #tpu.memory_space<vmem>>, %arg1: memref<16x128xf32, #tpu.memory_space<vmem>>, %arg2: memref<32x128xf32, #tpu.memory_space<vmem>>, %arg3: memref<1x128xf32, #tpu.memory_space<vmem>>, %arg4: memref<32x32xf32, #tpu.memory_space<vmem>>, %arg5: memref<1x32xf32, #tpu.memory_space<vmem>>, %arg6: memref<32x8xf32, #tpu.memory_space<vmem>>, %arg7: memref<1x8xf32, #tpu.memory_space<vmem>>, %arg8: memref<8x8xf32, #tpu.memory_space<vmem>>, %arg9: memref<8x32xf32, #tpu.memory_space<vmem>>) attributes {dimension_semantics = [], scalar_prefetch = 0 : i64, scratch_operands = 1 : i64, tpu.core_type = #tpu.core_type<tc>} {
    %c0 = arith.constant 0 : index
    %c0_0 = arith.constant 0 : index
    %0 = vector.load %arg1[%c0, %c0_0] : memref<16x128xf32, #tpu.memory_space<vmem>>, vector<16x128xf32>
    %c0_1 = arith.constant 0 : index
    %c0_2 = arith.constant 0 : index
    %1 = vector.load %arg2[%c0_1, %c0_2] : memref<32x128xf32, #tpu.memory_space<vmem>>, vector<32x128xf32>
    %c0_3 = arith.constant 0 : index
    %c0_4 = arith.constant 0 : index
    %2 = vector.load %arg3[%c0_3, %c0_4] : memref<1x128xf32, #tpu.memory_space<vmem>>, vector<1x128xf32>
    %cst = arith.constant 0.000000e+00 : f32
    %3 = vector.broadcast %cst : f32 to vector<3x32xf32>
    %cst_5 = arith.constant 0.000000e+00 : f32
    %4 = vector.broadcast %cst_5 : f32 to vector<3x32xf32>
    %c0_6 = arith.constant 0 : index
    %c0_7 = arith.constant 0 : index
    %c0_8 = arith.constant 0 : index
    %5 = vector.load %arg0[%c0_6, %c0_7, %c0_8] : memref<8x3x16xf32, #tpu.memory_space<vmem>>, vector<1x3x16xf32>
    %6 = vector.shape_cast %5 : vector<1x3x16xf32> to vector<3x16xf32>
    %cst_9 = arith.constant dense<0.000000e+00> : vector<3x128xf32>
    %7 = tpu.matmul %6, %0, %cst_9 {dimension_numbers = #tpu.dot_dimension_numbers<[1], [0], [0], [1], [0, 0, 1, 1], [], []>} : vector<3x16xf32>, vector<16x128xf32>, vector<3x128xf32> -> vector<3x128xf32>
    %cst_10 = arith.constant dense<0.000000e+00> : vector<3x128xf32>
    %8 = tpu.matmul %3, %1, %cst_10 {dimension_numbers = #tpu.dot_dimension_numbers<[1], [0], [0], [1], [0, 0, 1, 1], [], []>} : vector<3x32xf32>, vector<32x128xf32>, vector<3x128xf32> -> vector<3x128xf32>
    %9 = arith.addf %7, %8 : vector<3x128xf32>
    %10 = vector.broadcast %2 : vector<1x128xf32> to vector<3x128xf32>
    %11 = arith.addf %9, %10 : vector<3x128xf32>
    %12 = arith.negf %11 : vector<3x128xf32>
    %13 = math.exp %12 : vector<3x128xf32>
    %cst_11 = arith.constant 1.000000e+00 : f32
    %14 = vector.broadcast %cst_11 : f32 to vector<3x128xf32>
    %15 = arith.addf %14, %13 : vector<3x128xf32>
    %16 = arith.divf %14, %15 : vector<3x128xf32>
    %17 = math.tanh %11 : vector<3x128xf32>
    %18 = vector.extract_strided_slice %16 {offsets = [0, 0], sizes = [3, 32], strides = [1, 1]} : vector<3x128xf32> to vector<3x32xf32>
    %19 = vector.extract_strided_slice %16 {offsets = [0, 32], sizes = [3, 32], strides = [1, 1]} : vector<3x128xf32> to vector<3x32xf32>
    %20 = vector.extract_strided_slice %17 {offsets = [0, 64], sizes = [3, 32], strides = [1, 1]} : vector<3x128xf32> to vector<3x32xf32>
    %21 = vector.extract_strided_slice %16 {offsets = [0, 96], sizes = [3, 32], strides = [1, 1]} : vector<3x128xf32> to vector<3x32xf32>
    %22 = arith.mulf %19, %4 : vector<3x32xf32>
    %23 = arith.mulf %18, %20 : vector<3x32xf32>
    %24 = arith.addf %22, %23 : vector<3x32xf32>
    %25 = math.tanh %24 : vector<3x32xf32>
    %26 = arith.mulf %21, %25 : vector<3x32xf32>
    %27 = vector.extract_strided_slice %26 {offsets = [2, 0], sizes = [1, 32], strides = [1, 1]} : vector<3x32xf32> to vector<1x32xf32>
    %c0_12 = arith.constant 0 : index
    %c0_13 = arith.constant 0 : index
    %28 = vector.load %arg9[%c0_12, %c0_13] : memref<8x32xf32, #tpu.memory_space<vmem>>, vector<1x32xf32>
    tpu.vector_store %arg9[%c0_12, %c0_13], %27 {strides = array<i32>} : memref<8x32xf32, #tpu.memory_space<vmem>>, vector<1x32xf32>,
    %c1 = arith.constant 1 : index
    %c0_14 = arith.constant 0 : index
    %c0_15 = arith.constant 0 : index
    %29 = vector.load %arg0[%c1, %c0_14, %c0_15] : memref<8x3x16xf32, #tpu.memory_space<vmem>>, vector<1x3x16xf32>
    %30 = vector.shape_cast %29 : vector<1x3x16xf32> to vector<3x16xf32>
    %cst_16 = arith.constant dense<0.000000e+00> : vector<3x128xf32>
    %31 = tpu.matmul %30, %0, %cst_16 {dimension_numbers = #tpu.dot_dimension_numbers<[1], [0], [0], [1], [0, 0, 1, 1], [], []>} : vector<3x16xf32>, vector<16x128xf32>, vector<3x128xf32> -> vector<3x128xf32>
    %cst_17 = arith.constant dense<0.000000e+00> : vector<3x128xf32>
    %32 = tpu.matmul %26, %1, %cst_17 {dimension_numbers = #tpu.dot_dimension_numbers<[1], [0], [0], [1], [0, 0, 1, 1], [], []>} : vector<3x32xf32>, vector<32x128xf32>, vector<3x128xf32> -> vector<3x128xf32>
    %33 = arith.addf %31, %32 : vector<3x128xf32>
    %34 = vector.broadcast %2 : vector<1x128xf32> to vector<3x128xf32>
    %35 = arith.addf %33, %34 : vector<3x128xf32>
    %36 = arith.negf %35 : vector<3x128xf32>
    %37 = math.exp %36 : vector<3x128xf32>
    %cst_18 = arith.constant 1.000000e+00 : f32
    %38 = vector.broadcast %cst_18 : f32 to vector<3x128xf32>
    %39 = arith.addf %38, %37 : vector<3x128xf32>
    %40 = arith.divf %38, %39 : vector<3x128xf32>
    %41 = math.tanh %35 : vector<3x128xf32>
    %42 = vector.extract_strided_slice %40 {offsets = [0, 0], sizes = [3, 32], strides = [1, 1]} : vector<3x128xf32> to vector<3x32xf32>
    %43 = vector.extract_strided_slice %40 {offsets = [0, 32], sizes = [3, 32], strides = [1, 1]} : vector<3x128xf32> to vector<3x32xf32>
    %44 = vector.extract_strided_slice %41 {offsets = [0, 64], sizes = [3, 32], strides = [1, 1]} : vector<3x128xf32> to vector<3x32xf32>
    %45 = vector.extract_strided_slice %40 {offsets = [0, 96], sizes = [3, 32], strides = [1, 1]} : vector<3x128xf32> to vector<3x32xf32>
    %46 = arith.mulf %43, %24 : vector<3x32xf32>
    %47 = arith.mulf %42, %44 : vector<3x32xf32>
    %48 = arith.addf %46, %47 : vector<3x32xf32>
    %49 = math.tanh %48 : vector<3x32xf32>
    %50 = arith.mulf %45, %49 : vector<3x32xf32>
    %51 = vector.extract_strided_slice %50 {offsets = [2, 0], sizes = [1, 32], strides = [1, 1]} : vector<3x32xf32> to vector<1x32xf32>
    %c1_19 = arith.constant 1 : index
    %c0_20 = arith.constant 0 : index
    %52 = vector.load %arg9[%c1_19, %c0_20] : memref<8x32xf32, #tpu.memory_space<vmem>>, vector<1x32xf32>
    tpu.vector_store %arg9[%c1_19, %c0_20], %51 {strides = array<i32>} : memref<8x32xf32, #tpu.memory_space<vmem>>, vector<1x32xf32>,
    %c2 = arith.constant 2 : index
    %c0_21 = arith.constant 0 : index
    %c0_22 = arith.constant 0 : index
    %53 = vector.load %arg0[%c2, %c0_21, %c0_22] : memref<8x3x16xf32, #tpu.memory_space<vmem>>, vector<1x3x16xf32>
    %54 = vector.shape_cast %53 : vector<1x3x16xf32> to vector<3x16xf32>
    %cst_23 = arith.constant dense<0.000000e+00> : vector<3x128xf32>
    %55 = tpu.matmul %54, %0, %cst_23 {dimension_numbers = #tpu.dot_dimension_numbers<[1], [0], [0], [1], [0, 0, 1, 1], [], []>} : vector<3x16xf32>, vector<16x128xf32>, vector<3x128xf32> -> vector<3x128xf32>
    %cst_24 = arith.constant dense<0.000000e+00> : vector<3x128xf32>
    %56 = tpu.matmul %50, %1, %cst_24 {dimension_numbers = #tpu.dot_dimension_numbers<[1], [0], [0], [1], [0, 0, 1, 1], [], []>} : vector<3x32xf32>, vector<32x128xf32>, vector<3x128xf32> -> vector<3x128xf32>
    %57 = arith.addf %55, %56 : vector<3x128xf32>
    %58 = vector.broadcast %2 : vector<1x128xf32> to vector<3x128xf32>
    %59 = arith.addf %57, %58 : vector<3x128xf32>
    %60 = arith.negf %59 : vector<3x128xf32>
    %61 = math.exp %60 : vector<3x128xf32>
    %cst_25 = arith.constant 1.000000e+00 : f32
    %62 = vector.broadcast %cst_25 : f32 to vector<3x128xf32>
    %63 = arith.addf %62, %61 : vector<3x128xf32>
    %64 = arith.divf %62, %63 : vector<3x128xf32>
    %65 = math.tanh %59 : vector<3x128xf32>
    %66 = vector.extract_strided_slice %64 {offsets = [0, 0], sizes = [3, 32], strides = [1, 1]} : vector<3x128xf32> to vector<3x32xf32>
    %67 = vector.extract_strided_slice %64 {offsets = [0, 32], sizes = [3, 32], strides = [1, 1]} : vector<3x128xf32> to vector<3x32xf32>
    %68 = vector.extract_strided_slice %65 {offsets = [0, 64], sizes = [3, 32], strides = [1, 1]} : vector<3x128xf32> to vector<3x32xf32>
    %69 = vector.extract_strided_slice %64 {offsets = [0, 96], sizes = [3, 32], strides = [1, 1]} : vector<3x128xf32> to vector<3x32xf32>
    %70 = arith.mulf %67, %48 : vector<3x32xf32>
    %71 = arith.mulf %66, %68 : vector<3x32xf32>
    %72 = arith.addf %70, %71 : vector<3x32xf32>
    %73 = math.tanh %72 : vector<3x32xf32>
    %74 = arith.mulf %69, %73 : vector<3x32xf32>
    %75 = vector.extract_strided_slice %74 {offsets = [2, 0], sizes = [1, 32], strides = [1, 1]} : vector<3x32xf32> to vector<1x32xf32>
    %c2_26 = arith.constant 2 : index
    %c0_27 = arith.constant 0 : index
    %76 = vector.load %arg9[%c2_26, %c0_27] : memref<8x32xf32, #tpu.memory_space<vmem>>, vector<1x32xf32>
    tpu.vector_store %arg9[%c2_26, %c0_27], %75 {strides = array<i32>} : memref<8x32xf32, #tpu.memory_space<vmem>>, vector<1x32xf32>,
    %c3 = arith.constant 3 : index
    %c0_28 = arith.constant 0 : index
    %c0_29 = arith.constant 0 : index
    %77 = vector.load %arg0[%c3, %c0_28, %c0_29] : memref<8x3x16xf32, #tpu.memory_space<vmem>>, vector<1x3x16xf32>
    %78 = vector.shape_cast %77 : vector<1x3x16xf32> to vector<3x16xf32>
    %cst_30 = arith.constant dense<0.000000e+00> : vector<3x128xf32>
    %79 = tpu.matmul %78, %0, %cst_30 {dimension_numbers = #tpu.dot_dimension_numbers<[1], [0], [0], [1], [0, 0, 1, 1], [], []>} : vector<3x16xf32>, vector<16x128xf32>, vector<3x128xf32> -> vector<3x128xf32>
    %cst_31 = arith.constant dense<0.000000e+00> : vector<3x128xf32>
    %80 = tpu.matmul %74, %1, %cst_31 {dimension_numbers = #tpu.dot_dimension_numbers<[1], [0], [0], [1], [0, 0, 1, 1], [], []>} : vector<3x32xf32>, vector<32x128xf32>, vector<3x128xf32> -> vector<3x128xf32>
    %81 = arith.addf %79, %80 : vector<3x128xf32>
    %82 = vector.broadcast %2 : vector<1x128xf32> to vector<3x128xf32>
    %83 = arith.addf %81, %82 : vector<3x128xf32>
    %84 = arith.negf %83 : vector<3x128xf32>
    %85 = math.exp %84 : vector<3x128xf32>
    %cst_32 = arith.constant 1.000000e+00 : f32
    %86 = vector.broadcast %cst_32 : f32 to vector<3x128xf32>
    %87 = arith.addf %86, %85 : vector<3x128xf32>
    %88 = arith.divf %86, %87 : vector<3x128xf32>
    %89 = math.tanh %83 : vector<3x128xf32>
    %90 = vector.extract_strided_slice %88 {offsets = [0, 0], sizes = [3, 32], strides = [1, 1]} : vector<3x128xf32> to vector<3x32xf32>
    %91 = vector.extract_strided_slice %88 {offsets = [0, 32], sizes = [3, 32], strides = [1, 1]} : vector<3x128xf32> to vector<3x32xf32>
    %92 = vector.extract_strided_slice %89 {offsets = [0, 64], sizes = [3, 32], strides = [1, 1]} : vector<3x128xf32> to vector<3x32xf32>
    %93 = vector.extract_strided_slice %88 {offsets = [0, 96], sizes = [3, 32], strides = [1, 1]} : vector<3x128xf32> to vector<3x32xf32>
    %94 = arith.mulf %91, %72 : vector<3x32xf32>
    %95 = arith.mulf %90, %92 : vector<3x32xf32>
    %96 = arith.addf %94, %95 : vector<3x32xf32>
    %97 = math.tanh %96 : vector<3x32xf32>
    %98 = arith.mulf %93, %97 : vector<3x32xf32>
    %99 = vector.extract_strided_slice %98 {offsets = [2, 0], sizes = [1, 32], strides = [1, 1]} : vector<3x32xf32> to vector<1x32xf32>
    %c3_33 = arith.constant 3 : index
    %c0_34 = arith.constant 0 : index
    %100 = vector.load %arg9[%c3_33, %c0_34] : memref<8x32xf32, #tpu.memory_space<vmem>>, vector<1x32xf32>
    tpu.vector_store %arg9[%c3_33, %c0_34], %99 {strides = array<i32>} : memref<8x32xf32, #tpu.memory_space<vmem>>, vector<1x32xf32>,
    %c4 = arith.constant 4 : index
    %c0_35 = arith.constant 0 : index
    %c0_36 = arith.constant 0 : index
    %101 = vector.load %arg0[%c4, %c0_35, %c0_36] : memref<8x3x16xf32, #tpu.memory_space<vmem>>, vector<1x3x16xf32>
    %102 = vector.shape_cast %101 : vector<1x3x16xf32> to vector<3x16xf32>
    %cst_37 = arith.constant dense<0.000000e+00> : vector<3x128xf32>
    %103 = tpu.matmul %102, %0, %cst_37 {dimension_numbers = #tpu.dot_dimension_numbers<[1], [0], [0], [1], [0, 0, 1, 1], [], []>} : vector<3x16xf32>, vector<16x128xf32>, vector<3x128xf32> -> vector<3x128xf32>
    %cst_38 = arith.constant dense<0.000000e+00> : vector<3x128xf32>
    %104 = tpu.matmul %98, %1, %cst_38 {dimension_numbers = #tpu.dot_dimension_numbers<[1], [0], [0], [1], [0, 0, 1, 1], [], []>} : vector<3x32xf32>, vector<32x128xf32>, vector<3x128xf32> -> vector<3x128xf32>
    %105 = arith.addf %103, %104 : vector<3x128xf32>
    %106 = vector.broadcast %2 : vector<1x128xf32> to vector<3x128xf32>
    %107 = arith.addf %105, %106 : vector<3x128xf32>
    %108 = arith.negf %107 : vector<3x128xf32>
    %109 = math.exp %108 : vector<3x128xf32>
    %cst_39 = arith.constant 1.000000e+00 : f32
    %110 = vector.broadcast %cst_39 : f32 to vector<3x128xf32>
    %111 = arith.addf %110, %109 : vector<3x128xf32>
    %112 = arith.divf %110, %111 : vector<3x128xf32>
    %113 = math.tanh %107 : vector<3x128xf32>
    %114 = vector.extract_strided_slice %112 {offsets = [0, 0], sizes = [3, 32], strides = [1, 1]} : vector<3x128xf32> to vector<3x32xf32>
    %115 = vector.extract_strided_slice %112 {offsets = [0, 32], sizes = [3, 32], strides = [1, 1]} : vector<3x128xf32> to vector<3x32xf32>
    %116 = vector.extract_strided_slice %113 {offsets = [0, 64], sizes = [3, 32], strides = [1, 1]} : vector<3x128xf32> to vector<3x32xf32>
    %117 = vector.extract_strided_slice %112 {offsets = [0, 96], sizes = [3, 32], strides = [1, 1]} : vector<3x128xf32> to vector<3x32xf32>
    %118 = arith.mulf %115, %96 : vector<3x32xf32>
    %119 = arith.mulf %114, %116 : vector<3x32xf32>
    %120 = arith.addf %118, %119 : vector<3x32xf32>
    %121 = math.tanh %120 : vector<3x32xf32>
    %122 = arith.mulf %117, %121 : vector<3x32xf32>
    %123 = vector.extract_strided_slice %122 {offsets = [2, 0], sizes = [1, 32], strides = [1, 1]} : vector<3x32xf32> to vector<1x32xf32>
    %c4_40 = arith.constant 4 : index
    %c0_41 = arith.constant 0 : index
    %124 = vector.load %arg9[%c4_40, %c0_41] : memref<8x32xf32, #tpu.memory_space<vmem>>, vector<1x32xf32>
    tpu.vector_store %arg9[%c4_40, %c0_41], %123 {strides = array<i32>} : memref<8x32xf32, #tpu.memory_space<vmem>>, vector<1x32xf32>,
    %c5 = arith.constant 5 : index
    %c0_42 = arith.constant 0 : index
    %c0_43 = arith.constant 0 : index
    %125 = vector.load %arg0[%c5, %c0_42, %c0_43] : memref<8x3x16xf32, #tpu.memory_space<vmem>>, vector<1x3x16xf32>
    %126 = vector.shape_cast %125 : vector<1x3x16xf32> to vector<3x16xf32>
    %cst_44 = arith.constant dense<0.000000e+00> : vector<3x128xf32>
    %127 = tpu.matmul %126, %0, %cst_44 {dimension_numbers = #tpu.dot_dimension_numbers<[1], [0], [0], [1], [0, 0, 1, 1], [], []>} : vector<3x16xf32>, vector<16x128xf32>, vector<3x128xf32> -> vector<3x128xf32>
    %cst_45 = arith.constant dense<0.000000e+00> : vector<3x128xf32>
    %128 = tpu.matmul %122, %1, %cst_45 {dimension_numbers = #tpu.dot_dimension_numbers<[1], [0], [0], [1], [0, 0, 1, 1], [], []>} : vector<3x32xf32>, vector<32x128xf32>, vector<3x128xf32> -> vector<3x128xf32>
    %129 = arith.addf %127, %128 : vector<3x128xf32>
    %130 = vector.broadcast %2 : vector<1x128xf32> to vector<3x128xf32>
    %131 = arith.addf %129, %130 : vector<3x128xf32>
    %132 = arith.negf %131 : vector<3x128xf32>
    %133 = math.exp %132 : vector<3x128xf32>
    %cst_46 = arith.constant 1.000000e+00 : f32
    %134 = vector.broadcast %cst_46 : f32 to vector<3x128xf32>
    %135 = arith.addf %134, %133 : vector<3x128xf32>
    %136 = arith.divf %134, %135 : vector<3x128xf32>
    %137 = math.tanh %131 : vector<3x128xf32>
    %138 = vector.extract_strided_slice %136 {offsets = [0, 0], sizes = [3, 32], strides = [1, 1]} : vector<3x128xf32> to vector<3x32xf32>
    %139 = vector.extract_strided_slice %136 {offsets = [0, 32], sizes = [3, 32], strides = [1, 1]} : vector<3x128xf32> to vector<3x32xf32>
    %140 = vector.extract_strided_slice %137 {offsets = [0, 64], sizes = [3, 32], strides = [1, 1]} : vector<3x128xf32> to vector<3x32xf32>
    %141 = vector.extract_strided_slice %136 {offsets = [0, 96], sizes = [3, 32], strides = [1, 1]} : vector<3x128xf32> to vector<3x32xf32>
    %142 = arith.mulf %139, %120 : vector<3x32xf32>
    %143 = arith.mulf %138, %140 : vector<3x32xf32>
    %144 = arith.addf %142, %143 : vector<3x32xf32>
    %145 = math.tanh %144 : vector<3x32xf32>
    %146 = arith.mulf %141, %145 : vector<3x32xf32>
    %147 = vector.extract_strided_slice %146 {offsets = [2, 0], sizes = [1, 32], strides = [1, 1]} : vector<3x32xf32> to vector<1x32xf32>
    %c5_47 = arith.constant 5 : index
    %c0_48 = arith.constant 0 : index
    %148 = vector.load %arg9[%c5_47, %c0_48] : memref<8x32xf32, #tpu.memory_space<vmem>>, vector<1x32xf32>
    tpu.vector_store %arg9[%c5_47, %c0_48], %147 {strides = array<i32>} : memref<8x32xf32, #tpu.memory_space<vmem>>, vector<1x32xf32>,
    %c6 = arith.constant 6 : index
    %c0_49 = arith.constant 0 : index
    %c0_50 = arith.constant 0 : index
    %149 = vector.load %arg0[%c6, %c0_49, %c0_50] : memref<8x3x16xf32, #tpu.memory_space<vmem>>, vector<1x3x16xf32>
    %150 = vector.shape_cast %149 : vector<1x3x16xf32> to vector<3x16xf32>
    %cst_51 = arith.constant dense<0.000000e+00> : vector<3x128xf32>
    %151 = tpu.matmul %150, %0, %cst_51 {dimension_numbers = #tpu.dot_dimension_numbers<[1], [0], [0], [1], [0, 0, 1, 1], [], []>} : vector<3x16xf32>, vector<16x128xf32>, vector<3x128xf32> -> vector<3x128xf32>
    %cst_52 = arith.constant dense<0.000000e+00> : vector<3x128xf32>
    %152 = tpu.matmul %146, %1, %cst_52 {dimension_numbers = #tpu.dot_dimension_numbers<[1], [0], [0], [1], [0, 0, 1, 1], [], []>} : vector<3x32xf32>, vector<32x128xf32>, vector<3x128xf32> -> vector<3x128xf32>
    %153 = arith.addf %151, %152 : vector<3x128xf32>
    %154 = vector.broadcast %2 : vector<1x128xf32> to vector<3x128xf32>
    %155 = arith.addf %153, %154 : vector<3x128xf32>
    %156 = arith.negf %155 : vector<3x128xf32>
    %157 = math.exp %156 : vector<3x128xf32>
    %cst_53 = arith.constant 1.000000e+00 : f32
    %158 = vector.broadcast %cst_53 : f32 to vector<3x128xf32>
    %159 = arith.addf %158, %157 : vector<3x128xf32>
    %160 = arith.divf %158, %159 : vector<3x128xf32>
    %161 = math.tanh %155 : vector<3x128xf32>
    %162 = vector.extract_strided_slice %160 {offsets = [0, 0], sizes = [3, 32], strides = [1, 1]} : vector<3x128xf32> to vector<3x32xf32>
    %163 = vector.extract_strided_slice %160 {offsets = [0, 32], sizes = [3, 32], strides = [1, 1]} : vector<3x128xf32> to vector<3x32xf32>
    %164 = vector.extract_strided_slice %161 {offsets = [0, 64], sizes = [3, 32], strides = [1, 1]} : vector<3x128xf32> to vector<3x32xf32>
    %165 = vector.extract_strided_slice %160 {offsets = [0, 96], sizes = [3, 32], strides = [1, 1]} : vector<3x128xf32> to vector<3x32xf32>
    %166 = arith.mulf %163, %144 : vector<3x32xf32>
    %167 = arith.mulf %162, %164 : vector<3x32xf32>
    %168 = arith.addf %166, %167 : vector<3x32xf32>
    %169 = math.tanh %168 : vector<3x32xf32>
    %170 = arith.mulf %165, %169 : vector<3x32xf32>
    %171 = vector.extract_strided_slice %170 {offsets = [2, 0], sizes = [1, 32], strides = [1, 1]} : vector<3x32xf32> to vector<1x32xf32>
    %c6_54 = arith.constant 6 : index
    %c0_55 = arith.constant 0 : index
    %172 = vector.load %arg9[%c6_54, %c0_55] : memref<8x32xf32, #tpu.memory_space<vmem>>, vector<1x32xf32>
    tpu.vector_store %arg9[%c6_54, %c0_55], %171 {strides = array<i32>} : memref<8x32xf32, #tpu.memory_space<vmem>>, vector<1x32xf32>,
    %c7 = arith.constant 7 : index
    %c0_56 = arith.constant 0 : index
    %c0_57 = arith.constant 0 : index
    %173 = vector.load %arg0[%c7, %c0_56, %c0_57] : memref<8x3x16xf32, #tpu.memory_space<vmem>>, vector<1x3x16xf32>
    %174 = vector.shape_cast %173 : vector<1x3x16xf32> to vector<3x16xf32>
    %cst_58 = arith.constant dense<0.000000e+00> : vector<3x128xf32>
    %175 = tpu.matmul %174, %0, %cst_58 {dimension_numbers = #tpu.dot_dimension_numbers<[1], [0], [0], [1], [0, 0, 1, 1], [], []>} : vector<3x16xf32>, vector<16x128xf32>, vector<3x128xf32> -> vector<3x128xf32>
    %cst_59 = arith.constant dense<0.000000e+00> : vector<3x128xf32>
    %176 = tpu.matmul %170, %1, %cst_59 {dimension_numbers = #tpu.dot_dimension_numbers<[1], [0], [0], [1], [0, 0, 1, 1], [], []>} : vector<3x32xf32>, vector<32x128xf32>, vector<3x128xf32> -> vector<3x128xf32>
    %177 = arith.addf %175, %176 : vector<3x128xf32>
    %178 = vector.broadcast %2 : vector<1x128xf32> to vector<3x128xf32>
    %179 = arith.addf %177, %178 : vector<3x128xf32>
    %180 = arith.negf %179 : vector<3x128xf32>
    %181 = math.exp %180 : vector<3x128xf32>
    %cst_60 = arith.constant 1.000000e+00 : f32
    %182 = vector.broadcast %cst_60 : f32 to vector<3x128xf32>
    %183 = arith.addf %182, %181 : vector<3x128xf32>
    %184 = arith.divf %182, %183 : vector<3x128xf32>
    %185 = math.tanh %179 : vector<3x128xf32>
    %186 = vector.extract_strided_slice %184 {offsets = [0, 0], sizes = [3, 32], strides = [1, 1]} : vector<3x128xf32> to vector<3x32xf32>
    %187 = vector.extract_strided_slice %184 {offsets = [0, 32], sizes = [3, 32], strides = [1, 1]} : vector<3x128xf32> to vector<3x32xf32>
    %188 = vector.extract_strided_slice %185 {offsets = [0, 64], sizes = [3, 32], strides = [1, 1]} : vector<3x128xf32> to vector<3x32xf32>
    %189 = vector.extract_strided_slice %184 {offsets = [0, 96], sizes = [3, 32], strides = [1, 1]} : vector<3x128xf32> to vector<3x32xf32>
    %190 = arith.mulf %187, %168 : vector<3x32xf32>
    %191 = arith.mulf %186, %188 : vector<3x32xf32>
    %192 = arith.addf %190, %191 : vector<3x32xf32>
    %193 = math.tanh %192 : vector<3x32xf32>
    %194 = arith.mulf %189, %193 : vector<3x32xf32>
    %195 = vector.extract_strided_slice %194 {offsets = [2, 0], sizes = [1, 32], strides = [1, 1]} : vector<3x32xf32> to vector<1x32xf32>
    %c7_61 = arith.constant 7 : index
    %c0_62 = arith.constant 0 : index
    %196 = vector.load %arg9[%c7_61, %c0_62] : memref<8x32xf32, #tpu.memory_space<vmem>>, vector<1x32xf32>
    tpu.vector_store %arg9[%c7_61, %c0_62], %195 {strides = array<i32>} : memref<8x32xf32, #tpu.memory_space<vmem>>, vector<1x32xf32>,
    %c0_63 = arith.constant 0 : index
    %c0_64 = arith.constant 0 : index
    %197 = vector.load %arg9[%c0_63, %c0_64] : memref<8x32xf32, #tpu.memory_space<vmem>>, vector<8x32xf32>
    %c0_65 = arith.constant 0 : index
    %c0_66 = arith.constant 0 : index
    %198 = vector.load %arg4[%c0_65, %c0_66] : memref<32x32xf32, #tpu.memory_space<vmem>>, vector<32x32xf32>
    %cst_67 = arith.constant dense<0.000000e+00> : vector<8x32xf32>
    %199 = tpu.matmul %197, %198, %cst_67 {dimension_numbers = #tpu.dot_dimension_numbers<[1], [0], [0], [1], [0, 0, 1, 1], [], []>} : vector<8x32xf32>, vector<32x32xf32>, vector<8x32xf32> -> vector<8x32xf32>
    %c0_68 = arith.constant 0 : index
    %c0_69 = arith.constant 0 : index
    %200 = vector.load %arg5[%c0_68, %c0_69] : memref<1x32xf32, #tpu.memory_space<vmem>>, vector<1x32xf32>
    %201 = vector.broadcast %200 : vector<1x32xf32> to vector<8x32xf32>
    %202 = arith.addf %199, %201 : vector<8x32xf32>
    %cst_70 = arith.constant 0.000000e+00 : f32
    %203 = vector.broadcast %cst_70 : f32 to vector<8x32xf32>
    %204 = arith.maximumf %202, %203 : vector<8x32xf32>
    %c0_71 = arith.constant 0 : index
    %c0_72 = arith.constant 0 : index
    %205 = vector.load %arg6[%c0_71, %c0_72] : memref<32x8xf32, #tpu.memory_space<vmem>>, vector<32x8xf32>
    %cst_73 = arith.constant dense<0.000000e+00> : vector<8x8xf32>
    %206 = tpu.matmul %204, %205, %cst_73 {dimension_numbers = #tpu.dot_dimension_numbers<[1], [0], [0], [1], [0, 0, 1, 1], [], []>} : vector<8x32xf32>, vector<32x8xf32>, vector<8x8xf32> -> vector<8x8xf32>
    %c0_74 = arith.constant 0 : index
    %c0_75 = arith.constant 0 : index
    %207 = vector.load %arg7[%c0_74, %c0_75] : memref<1x8xf32, #tpu.memory_space<vmem>>, vector<1x8xf32>
    %208 = vector.broadcast %207 : vector<1x8xf32> to vector<8x8xf32>
    %209 = arith.addf %206, %208 : vector<8x8xf32>
    %c0_76 = arith.constant 0 : index
    %c0_77 = arith.constant 0 : index
    %210 = vector.load %arg8[%c0_76, %c0_77] : memref<8x8xf32, #tpu.memory_space<vmem>>, vector<8x8xf32>
    tpu.vector_store %arg8[%c0_76, %c0_77], %209 {strides = array<i32>} : memref<8x8xf32, #tpu.memory_space<vmem>>, vector<8x8xf32>,
    return
  }
}

</mosaic_0001>

<bundles_post_ra>
// kernel: tpu_custom_call.1
= control target key start
LH: loop header
LB: loop body
LE: loop exit
PB: predicated region body
PF: predicated region fallthrough
CT: control target
= control target key end

     0   :  { %v2101_v3 = vmov 0.0|0.0   ;;  %vm2102_vm0 = vmmov 0   ;;  %v2103_v9 = vmov 0.0   ;;  %s2401_s0 = inlined_call_operand.vmem [shape: f32[8,3,16], index: 0, kind: input, shape index: {}]   ;;  %s2402_s1 = inlined_call_operand.vmem [shape: f32[16,128], index: 1, kind: input, shape index: {}]   ;;  %s2403_s2 = inlined_call_operand.vmem [shape: f32[32,128], index: 2, kind: input, shape index: {}]   ;;  %s2404_s3 = inlined_call_operand.vmem [shape: f32[1,128], index: 3, kind: input, shape index: {}]   ;;  %s2405_s4 = inlined_call_operand.vmem [shape: f32[32,32], index: 4, kind: input, shape index: {}]   ;;  %s2406_s5 = inlined_call_operand.vmem [shape: f32[1,32], index: 5, kind: input, shape index: {}]   ;;  %s2407_s6 = inlined_call_operand.vmem [shape: f32[32,8], index: 6, kind: input, shape index: {}]   ;;  %s2408_s7 = inlined_call_operand.vmem [shape: f32[1,8], index: 7, kind: input, shape index: {}]   ;;  %s2409_s8 = inlined_call_operand.hbm [shape: f32[8,8], index: 8, kind: output, shape index: {}]  }
   0x1   :  { %v32_v0 = vld [vmem:[%s2403_s2] sm:$0xff]  ;;  %v33_v1 = vld [vmem:[%s2403_s2 + $0x8] sm:$0xff]  ;;  %1923 = vmatprep.subr.bf16.mxu0 %v2101_v3  ;;  %1929 = vmatprep.subr.bf16.mxu1 %v2101_v3  ;;  %v34_v6 = vld [vmem:[%s2403_s2 + $0x10] sm:$0xff] }
   0x2   :  { %v30_v2 = vld [vmem:[%s2402_s1] sm:$0xff]  ;;  %v2162_v4 = vpack.c.bf16 %v33_v1, %v32_v0  ;;  %v31_v5 = vld [vmem:[%s2402_s1 + $0x8] sm:$0xff]  ;;  %v35_v7 = vld [vmem:[%s2403_s2 + $0x18] sm:$0xff]  ;;  %1772 = vmatprep.mubr.msk.f32.mxu1 %vm2102_vm0, %v2103_v9  ;;  %1765 = vmatprep.mubr.msk.f32.mxu0 %vm2102_vm0, %v2103_v9 }
   0x3   :  { %v2174_v8 = vpack.c.bf16 %v31_v5, %v30_v2 }
   0x4   :  { %13 = vsyncpa [#allocation4], 0  ;;  %1925 = vmatpush3.bf16.msra.mxu0 %v2162_v4  ;;  %v2181_v10 = vpack.c.bf16 %v35_v7, %v34_v6  ;;  %v37_v11 = vld [vmem:[%s2401_s0] sm:$0x7]  ;;  %vm112_vm1 = vcmask 130048   ;;  %s2104_s19 = smov 64  }
   0x5   :  { %1926 = vmatprep.subr.bf16.mxu0 %v2101_v3  ;;  %1931 = vmatpush3.bf16.msra.mxu1 %v2174_v8  ;;  %v2206_v14 = vld [vmem:[%s2404_s3] ss:$0 sm:$0xff]  ;;  %s2105_s3 = smov 32   ;;  %v1651_v29 = vld [vmem:[%s2401_s0 + $0x4] sm:$0x7]  ;;  %vm221_vm2 = vcmask 256002  }
   0x6   :  { %1932 = vmatprep.subr.bf16.mxu1 %v2101_v3  ;;  %vm38_vm3 = vcmask 261120   ;;  %v1655_v50 = vld [vmem:[%s2401_s0 + $0x8] sm:$0x7]  ;;  %s2106_s27 = smov [#allocation3]   ;;  %vm1632_vm4 = vcmask 64512  }
   0x7   :  { %s1640_s28 = sshll.u32 %s2106_s27, 4  ;;  %s1641_s28 = int_to_ptr.vmem [resolvable:$true] %s1640_s28 }
   0x8   :  { %1928 = vmatpush3.bf16.msra.mxu0 %v2181_v10  ;;  %1773 = vmatmul.mubr.msk.f32.vlgmr.msra.gmra.mrb[0].mxu1 %vm112_vm1, %v37_v11  ;;  %p2082_p1 = scmp.lt.s32.totalorder %s1641_s28, %s1641_s28 }
   0x9   :  { %1934 = vmatpush3.bf16.msra.mxu1 %v2162_v4  ;;  %1938 = vmatprep.subr.bf16.mxu0 %v2101_v3 }
   0xa   :  { %1935 = vmatprep.subr.bf16.mxu1 %v2101_v3  ;;  %1783 = vmatprep.mubr.msk.f32.mxu1 %vm2102_vm0, %v2103_v9 }
   0xb   :  { %1766 = vmatmul.mubr.f32.vlgmr.msra.gmra.mrb[0].mxu0 %v2103_v9 }
   0xc   :  { %1940 = vmatpush3.bf16.msra.mxu0 %v2174_v8  ;;  %1790 = vmatprep.mubr.msk.f32.mxu0 %vm2102_vm0, %v2103_v9 }
   0xd   :  { %1937 = vmatpush3.bf16.msra.mxu1 %v2181_v10  ;;  %1941 = vmatprep.subr.bf16.mxu0 %v2101_v3 }
   0xe   :  { %1947 = vmatprep.subr.bf16.mxu1 %v2101_v3 }
   0xf   :  { %1791 = vmatmul.mubr.msk.f32.vlgmr.msra.gmra.mrb[2].mxu0 %vm112_vm1, %v1651_v29 }
  0x10   :  { %1943 = vmatpush3.bf16.msra.mxu0 %v2162_v4  ;;  %1801 = vmatprep.mubr.msk.f32.mxu0 %vm2102_vm0, %v2103_v9 }
  0x11   :  { %1944 = vmatprep.subr.bf16.mxu0 %v2101_v3 }
  0x14   :  { %1946 = vmatpush3.bf16.msra.mxu0 %v2181_v10 }
  0x15   :  { %1956 = vmatprep.subr.bf16.mxu0 %v2101_v3 }
  0xdb   :  { %v182_v12 = vpop.f32.mrb[0].mxu1 }
  0xdc   :  { %v1774_v13 = vpop.f32.mrb[1].mxu1 }
  0xde   :  { %v108_v15 = vpop.f32.mrb[0].mxu0 }
  0xdf   :  { %v183_v16 = vadd.f32 %v182_v12, %v108_v15  ;;  %v1767_v17 = vpop.f32.mrb[1].mxu0  ;;  %v1659_v12 = vld [vmem:[%s2401_s0 + $0xc] sm:$0x7] }
  0xe1   :  { %v192_v18 = vadd.f32 %v2206_v14, %v183_v16 }
  0xe2   :  { %v366_v33 = vpop.f32.mrb[2].mxu0 }
  0xe3   :  { %2013 = vtanh.f32 %v192_v18  ;;  %v1650_v20 = vmul.f32 -1.442695, %v192_v18  ;;  %v1792_v34 = vpop.f32.mrb[3].mxu0 }
  0xe4   :  { %v1663_v34 = vld [vmem:[%s2401_s0 + $0x10] sm:$0x7] }
  0xe5   :  { %2015 = vpow2.f32 %v1650_v20 }
  0xed   :  { %v2014_v19 = vpop.eup %2013 }
  0xee   :  { %202 = vrot.lane.b32.xlu0 %v2014_v19, %s2104_s19 }
  0xef   :  { %v2016_v21 = vpop.eup %2015 }
  0xf0   :  { %v196_v22 = vadd.f32 1.0, %v2016_v21 }
  0xf2   :  { %2017 = vrcp.f32 %v196_v22 }
  0xfc   :  { %v2018_v23 = vpop.eup %2017 }
  0xfd   :  { %v200_v26 = vmul.f32 0.0, %v2018_v23 }
 0x160   :  { %v203_v24 = vpop.permute.xlu0 %202 }
 0x161   :  { %v205_v25 = vmul.f32 %v2018_v23, %v203_v24 }
 0x163   :  { %207 = vrot.lane.b32.xlu0 %v205_v25, %s2105_s3 }
 0x1d5   :  { %v208_v27 = vpop.permute.xlu0 %207 }
 0x1d6   :  { %v210_v28 = vadd.f32 %v208_v27, %v200_v26 }
 0x1d8   :  { %2019 = vtanh.f32 %v210_v28 }
 0x1e2   :  { %v2020_v30 = vpop.eup %2019 }
 0x1e3   :  { %213 = vrot.lane.b32.xlu1 %v2020_v30, %s2104_s19 }
 0x255   :  { %v214_v31 = vpop.permute.xlu1 %213 }
 0x256   :  { %v216_v32 = vmul.f32 %v2018_v23, %v214_v31 }
 0x258   :  { %218 = vrot.lane.b32.xlu1 %v216_v32, %s2105_s3 }
 0x2ca   :  { %v219_v35 = vpop.permute.xlu1 %218 }
 0x2cb   :  { %222 = vst.msk [vmem:[#allocation2 - $0x2] sm:$0x4] %vm221_vm2, %v219_v35  ;;  %1784 = vmatmul.mubr.msk.f32.vlgmr.msra.gmra.mrb[2].mxu1 %vm38_vm3, %v219_v35 }
 0x2cc   :  { %1949 = vmatpush3.bf16.msra.mxu1 %v2174_v8  ;;  %1808 = vmatprep.mubr.msk.f32.mxu1 %vm2102_vm0, %v2103_v9 }
 0x2cd   :  { %1950 = vmatprep.subr.bf16.mxu1 %v2101_v3 }
 0x2cf   :  { %1809 = vmatmul.mubr.msk.f32.vlgmr.msra.gmra.mrb[4].mxu1 %vm112_vm1, %v1655_v50 }
 0x2d0   :  { %1952 = vmatpush3.bf16.msra.mxu1 %v2162_v4  ;;  %1819 = vmatprep.mubr.msk.f32.mxu1 %vm2102_vm0, %v2103_v9 }
 0x2d1   :  { %1953 = vmatprep.subr.bf16.mxu1 %v2101_v3 }
 0x2d4   :  { %1955 = vmatpush3.bf16.msra.mxu1 %v2181_v10 }
 0x2d5   :  { %1965 = vmatprep.subr.bf16.mxu1 %v2101_v3 }
 0x39e   :  { %v293_v36 = vpop.f32.mrb[2].mxu1 }
 0x39f   :  { %v367_v37 = vadd.f32 %v366_v33, %v293_v36  ;;  %v1785_v38 = vpop.f32.mrb[3].mxu1 }
 0x3a1   :  { %v370_v39 = vadd.f32 %v2206_v14, %v367_v37 }
 0x3a2   :  { %v543_v54 = vpop.f32.mrb[4].mxu1 }
 0x3a3   :  { %2021 = vtanh.f32 %v370_v39  ;;  %v1654_v41 = vmul.f32 -1.442695, %v370_v39  ;;  %v1810_v55 = vpop.f32.mrb[5].mxu1 }
 0x3a4   :  { %v1667_v55 = vld [vmem:[%s2401_s0 + $0x14] sm:$0x7] }
 0x3a5   :  { %2023 = vpow2.f32 %v1654_v41 }
 0x3ad   :  { %v2022_v40 = vpop.eup %2021 }
 0x3ae   :  { %380 = vrot.lane.b32.xlu0 %v2022_v40, %s2104_s19 }
 0x3af   :  { %v2024_v42 = vpop.eup %2023 }
 0x3b0   :  { %v374_v43 = vadd.f32 1.0, %v2024_v42 }
 0x3b2   :  { %2025 = vrcp.f32 %v374_v43 }
 0x3bc   :  { %v2026_v44 = vpop.eup %2025 }
 0x3bd   :  { %v378_v47 = vmul.f32 %v2026_v44, %v210_v28 }
 0x420   :  { %v381_v45 = vpop.permute.xlu0 %380 }
 0x421   :  { %v383_v46 = vmul.f32 %v2026_v44, %v381_v45 }
 0x423   :  { %385 = vrot.lane.b32.xlu1 %v383_v46, %s2105_s3 }
 0x495   :  { %v386_v48 = vpop.permute.xlu1 %385 }
 0x496   :  { %v388_v49 = vadd.f32 %v386_v48, %v378_v47 }
 0x498   :  { %2027 = vtanh.f32 %v388_v49 }
 0x4a2   :  { %v2028_v51 = vpop.eup %2027 }
 0x4a3   :  { %391 = vrot.lane.b32.xlu0 %v2028_v51, %s2104_s19 }
 0x515   :  { %v392_v52 = vpop.permute.xlu0 %391 }
 0x516   :  { %v394_v53 = vmul.f32 %v2026_v44, %v392_v52 }
 0x518   :  { %396 = vrot.lane.b32.xlu1 %v394_v53, %s2105_s3 }
 0x58a   :  { %v397_v56 = vpop.permute.xlu1 %396 }
 0x58b   :  { %399 = vst.msk [vmem:[#allocation2 - $0x1] sm:$0x4] %vm221_vm2, %v397_v56  ;;  %1802 = vmatmul.mubr.msk.f32.vlgmr.msra.gmra.mrb[4].mxu0 %vm38_vm3, %v397_v56 }
 0x58c   :  { %1958 = vmatpush3.bf16.msra.mxu0 %v2174_v8  ;;  %1826 = vmatprep.mubr.msk.f32.mxu0 %vm2102_vm0, %v2103_v9 }
 0x58d   :  { %1959 = vmatprep.subr.bf16.mxu0 %v2101_v3 }
 0x58f   :  { %1827 = vmatmul.mubr.msk.f32.vlgmr.msra.gmra.mrb[6].mxu0 %vm112_vm1, %v1659_v12 }
 0x590   :  { %1961 = vmatpush3.bf16.msra.mxu0 %v2162_v4  ;;  %1837 = vmatprep.mubr.msk.f32.mxu0 %vm2102_vm0, %v2103_v9 }
 0x591   :  { %1962 = vmatprep.subr.bf16.mxu0 %v2101_v3 }
 0x594   :  { %1964 = vmatpush3.bf16.msra.mxu0 %v2181_v10 }
 0x595   :  { %1974 = vmatprep.subr.bf16.mxu0 %v2101_v3 }
 0x65e   :  { %v470_v57 = vpop.f32.mrb[4].mxu0 }
 0x65f   :  { %v544_v58 = vadd.f32 %v543_v54, %v470_v57  ;;  %v1803_v59 = vpop.f32.mrb[5].mxu0 }
 0x661   :  { %v547_v60 = vadd.f32 %v2206_v14, %v544_v58 }
 0x662   :  { %v720_v17 = vpop.f32.mrb[6].mxu0 }
 0x663   :  { %2029 = vtanh.f32 %v547_v60  ;;  %v1658_v62 = vmul.f32 -1.442695, %v547_v60  ;;  %v1828_v18 = vpop.f32.mrb[7].mxu0 }
 0x664   :  { %v1671_v18 = vld [vmem:[%s2401_s0 + $0x18] sm:$0x7] }
 0x665   :  { %2031 = vpow2.f32 %v1658_v62 }
 0x66d   :  { %v2030_v61 = vpop.eup %2029 }
 0x66e   :  { %557 = vrot.lane.b32.xlu0 %v2030_v61, %s2104_s19 }
 0x66f   :  { %v2032_v63 = vpop.eup %2031 }
 0x670   :  { %v551_v0 = vadd.f32 1.0, %v2032_v63 }
 0x672   :  { %2033 = vrcp.f32 %v551_v0 }
 0x67c   :  { %v2034_v1 = vpop.eup %2033 }
 0x67d   :  { %v555_v6 = vmul.f32 %v2034_v1, %v388_v49 }
 0x6e0   :  { %v558_v2 = vpop.permute.xlu0 %557 }
 0x6e1   :  { %v560_v5 = vmul.f32 %v2034_v1, %v558_v2 }
 0x6e3   :  { %562 = vrot.lane.b32.xlu1 %v560_v5, %s2105_s3 }
 0x755   :  { %v563_v7 = vpop.permute.xlu1 %562 }
 0x756   :  { %v565_v11 = vadd.f32 %v563_v7, %v555_v6 }
 0x758   :  { %2035 = vtanh.f32 %v565_v11 }
 0x762   :  { %v2036_v13 = vpop.eup %2035 }
 0x763   :  { %568 = vrot.lane.b32.xlu0 %v2036_v13, %s2104_s19 }
 0x7d5   :  { %v569_v15 = vpop.permute.xlu0 %568 }
 0x7d6   :  { %v571_v16 = vmul.f32 %v2034_v1, %v569_v15 }
 0x7d8   :  { %573 = vrot.lane.b32.xlu1 %v571_v16, %s2105_s3 }
 0x84a   :  { %v574_v19 = vpop.permute.xlu1 %573 }
 0x84b   :  { %576 = vst.msk [vmem:[#allocation2] sm:$0x4] %vm221_vm2, %v574_v19  ;;  %1820 = vmatmul.mubr.msk.f32.vlgmr.msra.gmra.mrb[6].mxu1 %vm38_vm3, %v574_v19 }
 0x84c   :  { %1967 = vmatpush3.bf16.msra.mxu1 %v2174_v8  ;;  %1844 = vmatprep.mubr.msk.f32.mxu1 %vm2102_vm0, %v2103_v9 }
 0x84d   :  { %1968 = vmatprep.subr.bf16.mxu1 %v2101_v3 }
 0x84f   :  { %1845 = vmatmul.mubr.msk.f32.vlgmr.msra.gmra.mrb[8].mxu1 %vm112_vm1, %v1663_v34 }
 0x850   :  { %1970 = vmatpush3.bf16.msra.mxu1 %v2162_v4  ;;  %1855 = vmatprep.mubr.msk.f32.mxu1 %vm2102_vm0, %v2103_v9 }
 0x851   :  { %1971 = vmatprep.subr.bf16.mxu1 %v2101_v3 }
 0x854   :  { %1973 = vmatpush3.bf16.msra.mxu1 %v2181_v10 }
 0x855   :  { %1983 = vmatprep.subr.bf16.mxu1 %v2101_v3 }
 0x91e   :  { %v647_v20 = vpop.f32.mrb[6].mxu1 }
 0x91f   :  { %v721_v21 = vadd.f32 %v720_v17, %v647_v20  ;;  %v1821_v22 = vpop.f32.mrb[7].mxu1 }
 0x921   :  { %v724_v23 = vadd.f32 %v2206_v14, %v721_v21 }
 0x922   :  { %v897_v38 = vpop.f32.mrb[8].mxu1 }
 0x923   :  { %2037 = vtanh.f32 %v724_v23  ;;  %v1662_v25 = vmul.f32 -1.442695, %v724_v23  ;;  %v1846_v39 = vpop.f32.mrb[9].mxu1 }
 0x925   :  { %2039 = vpow2.f32 %v1662_v25 }
 0x92d   :  { %v2038_v24 = vpop.eup %2037 }
 0x92e   :  { %734 = vrot.lane.b32.xlu0 %v2038_v24, %s2104_s19 }
 0x92f   :  { %v2040_v26 = vpop.eup %2039 }
 0x930   :  { %v728_v27 = vadd.f32 1.0, %v2040_v26 }
 0x932   :  { %2041 = vrcp.f32 %v728_v27 }
 0x93c   :  { %v2042_v28 = vpop.eup %2041 }
 0x93d   :  { %v732_v31 = vmul.f32 %v2042_v28, %v565_v11 }
 0x9a0   :  { %v735_v29 = vpop.permute.xlu0 %734 }
 0x9a1   :  { %v737_v30 = vmul.f32 %v2042_v28, %v735_v29 }
 0x9a3   :  { %739 = vrot.lane.b32.xlu1 %v737_v30, %s2105_s3 }
 0xa15   :  { %v740_v32 = vpop.permute.xlu1 %739 }
 0xa16   :  { %v742_v33 = vadd.f32 %v740_v32, %v732_v31 }
 0xa18   :  { %2043 = vtanh.f32 %v742_v33 }
 0xa22   :  { %v2044_v35 = vpop.eup %2043 }
 0xa23   :  { %745 = vrot.lane.b32.xlu0 %v2044_v35, %s2104_s19 }
 0xa95   :  { %v746_v36 = vpop.permute.xlu0 %745 }
 0xa96   :  { %v748_v37 = vmul.f32 %v2042_v28, %v746_v36  ;;  %v1675_v36 = vld [vmem:[%s2401_s0 + $0x1c] sm:$0x7] }
 0xa98   :  { %750 = vrot.lane.b32.xlu1 %v748_v37, %s2105_s3 }
 0xb0a   :  { %v751_v40 = vpop.permute.xlu1 %750 }
 0xb0b   :  { %753 = vst.msk [vmem:[#allocation2 + $0x1] sm:$0x4] %vm221_vm2, %v751_v40  ;;  %1838 = vmatmul.mubr.msk.f32.vlgmr.msra.gmra.mrb[8].mxu0 %vm38_vm3, %v751_v40 }
 0xb0c   :  { %1976 = vmatpush3.bf16.msra.mxu0 %v2174_v8  ;;  %1862 = vmatprep.mubr.msk.f32.mxu0 %vm2102_vm0, %v2103_v9 }
 0xb0d   :  { %1977 = vmatprep.subr.bf16.mxu0 %v2101_v3 }
 0xb0f   :  { %1863 = vmatmul.mubr.msk.f32.vlgmr.msra.gmra.mrb[10].mxu0 %vm112_vm1, %v1667_v55 }
 0xb10   :  { %1979 = vmatpush3.bf16.msra.mxu0 %v2162_v4  ;;  %1873 = vmatprep.mubr.msk.f32.mxu0 %vm2102_vm0, %v2103_v9 }
 0xb11   :  { %1980 = vmatprep.subr.bf16.mxu0 %v2101_v3 }
 0xb14   :  { %1982 = vmatpush3.bf16.msra.mxu0 %v2181_v10 }
 0xb15   :  { %1992 = vmatprep.subr.bf16.mxu0 %v2101_v3 }
 0xbde   :  { %v824_v41 = vpop.f32.mrb[8].mxu0 }
 0xbdf   :  { %v898_v42 = vadd.f32 %v897_v38, %v824_v41  ;;  %v1839_v43 = vpop.f32.mrb[9].mxu0 }
 0xbe1   :  { %v901_v44 = vadd.f32 %v2206_v14, %v898_v42 }
 0xbe2   :  { %v1074_v59 = vpop.f32.mrb[10].mxu0 }
 0xbe3   :  { %2045 = vtanh.f32 %v901_v44  ;;  %v1666_v46 = vmul.f32 -1.442695, %v901_v44  ;;  %v1864_v60 = vpop.f32.mrb[11].mxu0 }
 0xbe4   :  { %v1466_v60 = vld [vmem:[%s2405_s4 + $0x18] sm:$0xff] }
 0xbe5   :  { %2047 = vpow2.f32 %v1666_v46 }
 0xbed   :  { %v2046_v45 = vpop.eup %2045 }
 0xbee   :  { %911 = vrot.lane.b32.xlu0 %v2046_v45, %s2104_s19 }
 0xbef   :  { %v2048_v47 = vpop.eup %2047 }
 0xbf0   :  { %v905_v48 = vadd.f32 1.0, %v2048_v47 }
 0xbf2   :  { %2049 = vrcp.f32 %v905_v48 }
 0xbfc   :  { %v2050_v49 = vpop.eup %2049 }
 0xbfd   :  { %v909_v52 = vmul.f32 %v2050_v49, %v742_v33 }
 0xc60   :  { %v912_v50 = vpop.permute.xlu0 %911 }
 0xc61   :  { %v914_v51 = vmul.f32 %v2050_v49, %v912_v50 }
 0xc63   :  { %916 = vrot.lane.b32.xlu1 %v914_v51, %s2105_s3 }
 0xcd5   :  { %v917_v53 = vpop.permute.xlu1 %916 }
 0xcd6   :  { %v919_v54 = vadd.f32 %v917_v53, %v909_v52 }
 0xcd8   :  { %2051 = vtanh.f32 %v919_v54 }
 0xce2   :  { %v2052_v56 = vpop.eup %2051 }
 0xce3   :  { %922 = vrot.lane.b32.xlu0 %v2052_v56, %s2104_s19 }
 0xd55   :  { %v923_v57 = vpop.permute.xlu0 %922 }
 0xd56   :  { %v925_v58 = vmul.f32 %v2050_v49, %v923_v57  ;;  %v1464_v57 = vld [vmem:[%s2405_s4 + $0x8] sm:$0xff] }
 0xd58   :  { %927 = vrot.lane.b32.xlu1 %v925_v58, %s2105_s3 }
 0xdca   :  { %v928_v61 = vpop.permute.xlu1 %927 }
 0xdcb   :  { %930 = vst.msk [vmem:[#allocation2 + $0x2] sm:$0x4] %vm221_vm2, %v928_v61  ;;  %1856 = vmatmul.mubr.msk.f32.vlgmr.msra.gmra.mrb[10].mxu1 %vm38_vm3, %v928_v61 }
 0xdcc   :  { %1985 = vmatpush3.bf16.msra.mxu1 %v2174_v8  ;;  %1880 = vmatprep.mubr.msk.f32.mxu1 %vm2102_vm0, %v2103_v9 }
 0xdcd   :  { %1986 = vmatprep.subr.bf16.mxu1 %v2101_v3 }
 0xdcf   :  { %1881 = vmatmul.mubr.msk.f32.vlgmr.msra.gmra.mrb[12].mxu1 %vm112_vm1, %v1671_v18  ;;  %v1681_v18 = vld [vmem:[%s2408_s7] ss:$0 sm:$0xff] }
 0xdd0   :  { %1988 = vmatpush3.bf16.msra.mxu1 %v2162_v4  ;;  %1891 = vmatprep.mubr.msk.f32.mxu1 %vm2102_vm0, %v2103_v9 }
 0xdd1   :  { %1989 = vmatprep.subr.bf16.mxu1 %v2101_v3 }
 0xdd4   :  { %1991 = vmatpush3.bf16.msra.mxu1 %v2181_v10 }
 0xdd5   :  { %2001 = vmatprep.subr.bf16.mxu1 %v2101_v3 }
 0xe9e   :  { %v1001_v62 = vpop.f32.mrb[10].mxu1 }
 0xe9f   :  { %v1075_v63 = vadd.f32 %v1074_v59, %v1001_v62  ;;  %v1857_v0 = vpop.f32.mrb[11].mxu1  ;;  %v1465_v59 = vld [vmem:[%s2405_s4 + $0x10] sm:$0xff]  ;;  %v1548_v62 = vld [vmem:[%s2407_s6] sm:$0xff] }
 0xea0   :  { %v1999_v61 = vpack.c.bf16 %v1466_v60, %v1465_v59 }
 0xea1   :  { %v1078_v1 = vadd.f32 %v2206_v14, %v1075_v63  ;;  %v1549_v63 = vld [vmem:[%s2407_s6 + $0x8] sm:$0xff] }
 0xea2   :  { %v1251_v22 = vpop.f32.mrb[12].mxu1  ;;  %v2002_v0 = vpack.c.bf16 %v1549_v63, %v1548_v62 }
 0xea3   :  { %2053 = vtanh.f32 %v1078_v1  ;;  %v1670_v5 = vmul.f32 -1.442695, %v1078_v1  ;;  %v1882_v23 = vpop.f32.mrb[13].mxu1 }
 0xea5   :  { %2055 = vpow2.f32 %v1670_v5 }
 0xead   :  { %v2054_v2 = vpop.eup %2053 }
 0xeae   :  { %1088 = vrot.lane.b32.xlu0 %v2054_v2, %s2104_s19 }
 0xeaf   :  { %v2056_v6 = vpop.eup %2055 }
 0xeb0   :  { %v1082_v7 = vadd.f32 1.0, %v2056_v6 }
 0xeb2   :  { %2057 = vrcp.f32 %v1082_v7  ;;  %v1550_v7 = vld [vmem:[%s2407_s6 + $0x10] sm:$0xff] }
 0xebc   :  { %v2058_v11 = vpop.eup %2057 }
 0xebd   :  { %v1086_v15 = vmul.f32 %v2058_v11, %v919_v54 }
 0xf20   :  { %v1089_v12 = vpop.permute.xlu0 %1088 }
 0xf21   :  { %v1091_v13 = vmul.f32 %v2058_v11, %v1089_v12 }
 0xf23   :  { %1093 = vrot.lane.b32.xlu1 %v1091_v13, %s2105_s3 }
 0xf95   :  { %v1094_v16 = vpop.permute.xlu1 %1093 }
 0xf96   :  { %v1096_v17 = vadd.f32 %v1094_v16, %v1086_v15 }
 0xf98   :  { %2059 = vtanh.f32 %v1096_v17 }
 0xfa2   :  { %v2060_v19 = vpop.eup %2059 }
 0xfa3   :  { %1099 = vrot.lane.b32.xlu0 %v2060_v19, %s2104_s19 }
0x1015   :  { %v1100_v20 = vpop.permute.xlu0 %1099 }
0x1016   :  { %v1102_v21 = vmul.f32 %v2058_v11, %v1100_v20  ;;  %v1551_v11 = vld [vmem:[%s2407_s6 + $0x18] sm:$0xff]  ;;  %s2077_s6 = scalar_lea.vmem %s1641_s28, 128 }
0x1017   :  { %v2005_v12 = vpack.c.bf16 %v1551_v11, %v1550_v7  ;;  %p2078_p0 = scmp.ne.s32.totalorder %s1641_s28, %s2077_s6  ;;  %p2083_p2 = scmp.lt.s32.totalorder %s2077_s6, %s2077_s6 }
0x1018   :  { %1104 = vrot.lane.b32.xlu1 %v1102_v21, %s2105_s3 }
0x1019   :  { %p2084_p3 = por %p2083_p2, %p2082_p1 }
0x101b   :  { %p2085_p4 = pnand %p2084_p3, %p2078_p0 }
0x108a   :  { %v1105_v24 = vpop.permute.xlu1 %1104 }
0x108b   :  { %1107 = vst.msk [vmem:[#allocation2 + $0x3] sm:$0x4] %vm221_vm2, %v1105_v24  ;;  %1874 = vmatmul.mubr.msk.f32.vlgmr.msra.gmra.mrb[12].mxu0 %vm38_vm3, %v1105_v24 }
0x108c   :  { %1994 = vmatpush3.bf16.msra.mxu0 %v2174_v8  ;;  %1898 = vmatprep.mubr.msk.f32.mxu0 %vm2102_vm0, %v2103_v9 }
0x108d   :  { %1995 = vmatprep.subr.bf16.mxu0 %v2101_v3 }
0x108f   :  { %1899 = vmatmul.mubr.msk.f32.vlgmr.msra.gmra.mrb[14].mxu0 %vm112_vm1, %v1675_v36 }
0x1090   :  { %1909 = vmatprep.mubr.msk.f32.mxu0 %vm2102_vm0, %v2103_v9 }
0x115e   :  { %v1178_v4 = vpop.f32.mrb[12].mxu0 }
0x115f   :  { %v1252_v10 = vadd.f32 %v1251_v22, %v1178_v4  ;;  %v1875_v25 = vpop.f32.mrb[13].mxu0 }
0x1161   :  { %v1255_v26 = vadd.f32 %v2206_v14, %v1252_v10 }
0x1162   :  { %v1428_v40 = vpop.f32.mrb[14].mxu0 }
0x1163   :  { %2061 = vtanh.f32 %v1255_v26  ;;  %v1674_v28 = vmul.f32 -1.442695, %v1255_v26  ;;  %v1900_v41 = vpop.f32.mrb[15].mxu0 }
0x1165   :  { %2063 = vpow2.f32 %v1674_v28 }
0x116d   :  { %v2062_v27 = vpop.eup %2061 }
0x116e   :  { %1265 = vrot.lane.b32.xlu0 %v2062_v27, %s2104_s19 }
0x116f   :  { %v2064_v29 = vpop.eup %2063 }
0x1170   :  { %v1259_v30 = vadd.f32 1.0, %v2064_v29 }
0x1172   :  { %2065 = vrcp.f32 %v1259_v30 }
0x117c   :  { %v2066_v8 = vpop.eup %2065 }
0x117d   :  { %v1263_v33 = vmul.f32 %v2066_v8, %v1096_v17 }
0x11e0   :  { %v1266_v31 = vpop.permute.xlu0 %1265 }
0x11e1   :  { %v1268_v32 = vmul.f32 %v2066_v8, %v1266_v31 }
0x11e3   :  { %1270 = vrot.lane.b32.xlu1 %v1268_v32, %s2105_s3 }
0x1255   :  { %v1271_v34 = vpop.permute.xlu1 %1270 }
0x1256   :  { %v1273_v35 = vadd.f32 %v1271_v34, %v1263_v33 }
0x1258   :  { %2067 = vtanh.f32 %v1273_v35 }
0x1262   :  { %v2068_v37 = vpop.eup %2067 }
0x1263   :  { %1276 = vrot.lane.b32.xlu0 %v2068_v37, %s2104_s19 }
0x12d5   :  { %v1277_v38 = vpop.permute.xlu0 %1276 }
0x12d6   :  { %v1279_v39 = vmul.f32 %v2066_v8, %v1277_v38 }
0x12d8   :  { %1281 = vrot.lane.b32.xlu1 %v1279_v39, %s2105_s3 }
0x134a   :  { %v1282_v42 = vpop.permute.xlu1 %1281 }
0x134b   :  { %1284 = vst.msk [vmem:[#allocation2 + $0x4] sm:$0x4] %vm221_vm2, %v1282_v42  ;;  %1892 = vmatmul.mubr.msk.f32.vlgmr.msra.gmra.mrb[14].mxu1 %vm38_vm3, %v1282_v42 }
0x134c   :  { %1920 = vmatprep.mubr.msk.f32.mxu1 %vm2102_vm0, %v2103_v9  ;;  %2003 = vmatpush3.bf16.msra.mxu1 %v2002_v0 }
0x134d   :  { %2004 = vmatprep.subr.bf16.mxu1 %v2101_v3 }
0x1350   :  { %2006 = vmatpush3.bf16.msra.mxu1 %v2005_v12 }
0x141e   :  { %v1355_v43 = vpop.f32.mrb[14].mxu1 }
0x141f   :  { %v1429_v44 = vadd.f32 %v1428_v40, %v1355_v43  ;;  %v1893_v45 = vpop.f32.mrb[15].mxu1 }
0x1421   :  { %v1432_v46 = vadd.f32 %v2206_v14, %v1429_v44  ;;  %v1463_v14 = vld [vmem:[%s2405_s4] sm:$0xff] }
0x1422   :  { %v1996_v58 = vpack.c.bf16 %v1464_v57, %v1463_v14 }
0x1423   :  { %2069 = vtanh.f32 %v1432_v46  ;;  %v1678_v48 = vmul.f32 -1.442695, %v1432_v46 }
0x1424   :  { %1997 = vmatpush3.bf16.msra.mxu0 %v1996_v58 }
0x1425   :  { %2071 = vpow2.f32 %v1678_v48  ;;  %1998 = vmatprep.subr.bf16.mxu0 %v2101_v3  ;;  %v1679_v3 = vld [vmem:[%s2406_s5] ss:$0 sm:$0xff] }
0x1428   :  { %2000 = vmatpush3.bf16.msra.mxu0 %v1999_v61 }
0x142d   :  { %v2070_v47 = vpop.eup %2069 }
0x142e   :  { %1442 = vrot.lane.b32.xlu0 %v2070_v47, %s2104_s19 }
0x142f   :  { %v2072_v49 = vpop.eup %2071 }
0x1430   :  { %v1436_v50 = vadd.f32 1.0, %v2072_v49 }
0x1432   :  { %2073 = vrcp.f32 %v1436_v50 }
0x143c   :  { %v2074_v51 = vpop.eup %2073 }
0x143d   :  { %v1440_v9 = vmul.f32 %v2074_v51, %v1273_v35 }
0x14a0   :  { %v1443_v52 = vpop.permute.xlu0 %1442 }
0x14a1   :  { %v1445_v53 = vmul.f32 %v2074_v51, %v1443_v52 }
0x14a3   :  { %1447 = vrot.lane.b32.xlu1 %v1445_v53, %s2105_s3 }
0x1515   :  { %v1448_v54 = vpop.permute.xlu1 %1447 }
0x1516   :  { %v1450_v55 = vadd.f32 %v1448_v54, %v1440_v9 }
0x1518   :  { %2075 = vtanh.f32 %v1450_v55 }
0x1522   :  { %v2076_v56 = vpop.eup %2075 }
0x1523   :  { %1453 = vrot.lane.b32.xlu0 %v2076_v56, %s2104_s19 }
0x1595   :  { %v1454_v1 = vpop.permute.xlu0 %1453 }
0x1596   :  { %v1456_v2 = vmul.f32 %v2074_v51, %v1454_v1 }
0x1598   :  { %1458 = vrot.lane.b32.xlu1 %v1456_v2, %s2105_s3 }
0x160a   :  { %v1459_v5 = vpop.permute.xlu1 %1458 }
0x160b   :  { %1461 = vst.msk [vmem:[#allocation2 + $0x5] sm:$0x4] %vm221_vm2, %v1459_v5 }
0x1612   :  { %v1462_v6 = vld [vmem:[#allocation2] sm:$0xff] }
0x1613   :  { %1910 = vmatmul.mubr.msk.f32.vlgmr.msra.gmra.mrb[16].mxu0 %vm38_vm3, %v1462_v6 }
0x16e6   :  { %v1543_v13 = vpop.f32.mrb[16].mxu0 }
0x16e7   :  { %v1544_v15 = vadd.f32 %v1679_v3, %v1543_v13  ;;  %v1911_v16 = vpop.f32.mrb[17].mxu0 }
0x16e9   :  { %v1547_v17 = vmax.f32 %v1544_v15, 0.0 }
0x16eb   :  { %1921 = vmatmul.mubr.msk.f32.vlgmr.msra.gmra.mrb[16].mxu1 %vm38_vm3, %v1547_v17 }
0x17be   :  { %v1628_v19 = vpop.f32.mrb[16].mxu1 }
0x17bf   :  { %v1629_v20 = vadd.f32 %v1681_v18, %v1628_v19  ;;  %v1922_v21 = vpop.f32.mrb[17].mxu1 }
0x17c1   :  { %1633 = vst.msk [vmem:[#allocation3] sm:$0xff] %vm1632_vm4, %v1629_v20 }
0x17c2   :  { %2088 = shalt.err (!%p2085_p4)
}
0x17c3   :  { %s2089_s30 = scalar_lea.hbm %s2409_s8, 128 }
0x17c4   :  { %p2090_p5 = scmp.ne.s32.totalorder %s2409_s8, %s2089_s30  ;;  %p2093_p6 = scmp.lt.u32.totalorder %s2089_s30, %s2409_s8 }
0x17c6   :  { %p2095_p7 = pnand %p2093_p6, %p2090_p5 }
0x17c8   :  { %2098 = shalt.err (!%p2095_p7)
}
0x17c9   :  { %1643 = dma.vmem_to_hbm [thread:$0]  %s1641_s28, 128, %s2409_s8, [#allocation4]  }
0x17ca   :  { %2099 = dma.done.wait [#allocation4], 128  }
0x17cb   :  { %2100 = vsyncadd [#allocation4], 4294967168 }
0x17cc   :  { %1647 = vsyncpa [#allocation4], 1 }

</bundles_post_ra>
